<compile_context>
chip_gen: v6e
topology: v6e:2x2x1
jax: 0.10.0
libtpu: 0.0.40
codegen_flags: <defaults>
</compile_context>

<pallas_src>
import jax
import jax.numpy as jnp
from jax.experimental import pallas as pl
from jax.experimental.pallas import tpu as pltpu


def _round_up(x, m):
    return ((x + m - 1) // m) * m


def _decoder_kernel(z_ref, w1_ref, b1_ref, w2_ref, b2_ref, out_ref):
    # In-kernel downcast of the streamed activation tile (hidden under DMA);
    # z stays f32 in HBM so the wrapper never makes an extra cast copy.
    z = z_ref[...].astype(w1_ref.dtype)

    # Layer 1: bf16 MXU matmul, f32 accumulate; f32 epilogue (bias + ReLU).
    h = jnp.dot(z, w1_ref[...], preferred_element_type=jnp.float32)
    h = jnp.maximum(h + b1_ref[...], 0.0)

    # Layer 2: cast activations down to the weight dtype for the MXU,
    # accumulate in f32.
    o = jnp.dot(h.astype(w2_ref.dtype), w2_ref[...],
                preferred_element_type=jnp.float32)
    o = o + b2_ref[...]

    # sigmoid(o) = 1 / (1 + exp(-o)); exp lands on the EUP slot and the
    # approximate reciprocal avoids a full-precision VALU divide.
    out_ref[...] = pl.reciprocal(1.0 + jnp.exp(-o),
                                 approx=True).astype(out_ref.dtype)


def prepare_decoder_params(w1, b1, w2, b2, *, matmul_dtype=jnp.bfloat16):
    """One-time parameter preprocessing (call at init, NOT per forward).

    * Casts weights to the MXU dtype once (removes the per-call f32->bf16
      re-cast HBM pass flagged in the perf review).
    * Pads the output feature dim up to a multiple of 128 so every output
      store is lane-dense (unmasked vst) regardless of the real Dout.
    Weight convention: y = x @ W (i.e. PyTorch nn.Linear.weight transposed).
    """
    dz, h = w1.shape
    h2, dout = w2.shape
    assert h2 == h, "w1/w2 inner dims must match"

    dout_pad = _round_up(dout, 128)
    w1c = jnp.asarray(w1, matmul_dtype)
    b1c = jnp.asarray(b1, jnp.float32).reshape(1, h)
    w2f = jnp.asarray(w2, jnp.float32)
    b2c = jnp.asarray(b2, jnp.float32).reshape(1, dout)
    if dout_pad != dout:
        w2f = jnp.pad(w2f, ((0, 0), (0, dout_pad - dout)))
        b2c = jnp.pad(b2c, ((0, 0), (0, dout_pad - dout)))
    w2c = w2f.astype(matmul_dtype)

    return dict(w1=w1c, b1=b1c, w2=w2c, b2=b2c,
                dz=dz, h=h, dout=dout, dout_pad=dout_pad)


def decoder_forward(z, params, *, tm=None, out_dtype=jnp.bfloat16):
    """Pallas-fused FC decode: sigmoid(relu(z @ w1 + b1) @ w2 + b2).

    z      : (B, Dz) float32 (cast to bf16 inside the kernel)
    params : output of prepare_decoder_params (bf16 weights, padded Dout)
    """
    B, Dz = z.shape
    assert Dz == params["dz"]
    H, Dout, Dout_pad = params["h"], params["dout"], params["dout_pad"]
    w1, b1, w2, b2 = params["w1"], params["b1"], params["w2"], params["b2"]

    # Batch tile: 2-way split (both v7x TCs get a tile via the "parallel"
    # grid axis; the extra step on single-TC v5e/v6e costs ~0.35 us), rows a
    # multiple of 8 sublanes, capped at 512 so big batches still pipeline.
    b8 = _round_up(B, 8)
    if tm is None:
        tm = b8 if b8 <= 8 else min(512, _round_up(pl.cdiv(b8, 2), 8))
    tm = max(8, _round_up(min(tm, b8), 8))

    b_pad = _round_up(B, tm)
    if b_pad != B:
        # Only reached when tm does not evenly cover B (never for the demo
        # shapes); padded rows are sliced off below, never aliased/accumulated.
        z = jnp.pad(z, ((0, b_pad - B), (0, 0)))

    grid = (b_pad // tm,)

    # Advisory scheduling hint for XLA around the custom call.
    out_itemsize = jnp.dtype(out_dtype).itemsize
    cost = pl.CostEstimate(
        flops=2 * b_pad * (Dz * H + H * Dout_pad),
        transcendentals=b_pad * Dout_pad,
        bytes_accessed=(z.size * z.dtype.itemsize
                        + w1.size * w1.dtype.itemsize
                        + b1.size * b1.dtype.itemsize
                        + w2.size * w2.dtype.itemsize
                        + b2.size * b2.dtype.itemsize
                        + b_pad * Dout_pad * out_itemsize),
    )

    out = pl.pallas_call(
        _decoder_kernel,
        out_shape=jax.ShapeDtypeStruct((b_pad, Dout_pad), out_dtype),
        grid_spec=pltpu.PrefetchScalarGridSpec(
            num_scalar_prefetch=0,
            grid=grid,
            in_specs=[
                # Activations stream per batch tile (double-buffered).
                pl.BlockSpec((tm, Dz), lambda i: (i, 0)),
                # Weights / biases: constant index_map -> VMEM-resident across
                # all grid steps (tiny; double-buffer overhead is negligible).
                pl.BlockSpec((Dz, H), lambda i: (0, 0)),
                pl.BlockSpec((1, H), lambda i: (0, 0)),
                pl.BlockSpec((H, Dout_pad), lambda i: (0, 0)),
                pl.BlockSpec((1, Dout_pad), lambda i: (0, 0)),
            ],
            out_specs=pl.BlockSpec((tm, Dout_pad), lambda i: (i, 0)),
        ),
        compiler_params=pltpu.CompilerParams(
            # Independent batch tiles -> shard the grid across TensorCores.
            dimension_semantics=("parallel",),
        ),
        cost_estimate=cost,
    )(z, w1, b1, w2, b2)

    return out[:B, :Dout]


def reference_forward(z, w1, b1, w2, b2):
    h = jnp.maximum(z @ w1 + b1.reshape(1, -1), 0.0)
    return jax.nn.sigmoid(h @ w2 + b2.reshape(1, -1))


if __name__ == "__main__":
    # Small, TPU-friendly shapes: batch=256 (2 tiles of 128), latent=32,
    # hidden=128, out=256.
    B, Dz, H, Dout = 256, 32, 128, 256

    key = jax.random.PRNGKey(0)
    kz, k1, k2, k3, k4 = jax.random.split(key, 5)

    z = jax.random.normal(kz, (B, Dz), dtype=jnp.float32)
    # Deterministic parameter init (scaled normals ~ Kaiming-ish).
    w1 = jax.random.normal(k1, (Dz, H), dtype=jnp.float32) * (1.0 / Dz**0.5)
    b1 = jax.random.normal(k2, (H,), dtype=jnp.float32) * 0.01
    w2 = jax.random.normal(k3, (H, Dout), dtype=jnp.float32) * (1.0 / H**0.5)
    b2 = jax.random.normal(k4, (Dout,), dtype=jnp.float32) * 0.01

    # One-time prep (bf16 weight cache + lane padding) -- amortized at init.
    params = prepare_decoder_params(w1, b1, w2, b2)

    out = decoder_forward(z, params)
    out = jax.block_until_ready(out)

    ref = reference_forward(z, w1, b1, w2, b2)
    assert out.shape == (B, Dout)
    # bf16 matmul operands + bf16 output + approx reciprocal -> loosened
    # tolerance vs. the pure-f32 reference (sigmoid output is in [0, 1]).
    assert jnp.allclose(out.astype(jnp.float32), ref, atol=2e-2, rtol=2e-2), \
        "mismatch vs reference"

    print("KERNEL_OK")
</pallas_src>

<mosaic_0001>
module attributes {stable_mosaic.version = 11 : i64} {
  func.func @_decoder_kernel(%arg0: i32, %arg1: memref<128x32xf32, #tpu.memory_space<vmem>>, %arg2: memref<32x128xbf16, #tpu.memory_space<vmem>>, %arg3: memref<1x128xf32, #tpu.memory_space<vmem>>, %arg4: memref<128x256xbf16, #tpu.memory_space<vmem>>, %arg5: memref<1x256xf32, #tpu.memory_space<vmem>>, %arg6: memref<128x256xbf16, #tpu.memory_space<vmem>>) attributes {dimension_semantics = [#tpu.dimension_semantics<parallel>], iteration_bounds = array<i64: 2>, scalar_prefetch = 0 : i64, scratch_operands = 0 : i64, tpu.core_type = #tpu.core_type<tc>, window_params = [{transform_indices = @transform_0, window_bounds = array<i64: 128, 32>}, {pipeline_mode = #tpu.pipeline_mode<synchronous>, transform_indices = @transform_1, window_bounds = array<i64: 32, 128>}, {pipeline_mode = #tpu.pipeline_mode<synchronous>, transform_indices = @transform_2, window_bounds = array<i64: 1, 128>}, {pipeline_mode = #tpu.pipeline_mode<synchronous>, transform_indices = @transform_3, window_bounds = array<i64: 128, 256>}, {pipeline_mode = #tpu.pipeline_mode<synchronous>, transform_indices = @transform_4, window_bounds = array<i64: 1, 256>}, {transform_indices = @transform_5, window_bounds = array<i64: 128, 256>}]} {
    %c0 = arith.constant 0 : index
    %c0_0 = arith.constant 0 : index
    %0 = vector.load %arg1[%c0, %c0_0] : memref<128x32xf32, #tpu.memory_space<vmem>>, vector<128x32xf32>
    %1 = arith.truncf %0 : vector<128x32xf32> to vector<128x32xbf16>
    %c0_1 = arith.constant 0 : index
    %c0_2 = arith.constant 0 : index
    %2 = vector.load %arg2[%c0_1, %c0_2] : memref<32x128xbf16, #tpu.memory_space<vmem>>, vector<32x128xbf16>
    %cst = arith.constant dense<0.000000e+00> : vector<128x128xf32>
    %3 = tpu.matmul %1, %2, %cst {dimension_numbers = #tpu.dot_dimension_numbers<[1], [0], [0], [1], [0, 0, 1, 1], [], []>} : vector<128x32xbf16>, vector<32x128xbf16>, vector<128x128xf32> -> vector<128x128xf32>
    %c0_3 = arith.constant 0 : index
    %c0_4 = arith.constant 0 : index
    %4 = vector.load %arg3[%c0_3, %c0_4] : memref<1x128xf32, #tpu.memory_space<vmem>>, vector<1x128xf32>
    %5 = vector.broadcast %4 : vector<1x128xf32> to vector<128x128xf32>
    %6 = arith.addf %3, %5 : vector<128x128xf32>
    %cst_5 = arith.constant 0.000000e+00 : f32
    %7 = vector.broadcast %cst_5 : f32 to vector<128x128xf32>
    %8 = arith.maximumf %6, %7 : vector<128x128xf32>
    %9 = arith.truncf %8 : vector<128x128xf32> to vector<128x128xbf16>
    %c0_6 = arith.constant 0 : index
    %c0_7 = arith.constant 0 : index
    %10 = vector.load %arg4[%c0_6, %c0_7] : memref<128x256xbf16, #tpu.memory_space<vmem>>, vector<128x256xbf16>
    %cst_8 = arith.constant dense<0.000000e+00> : vector<128x256xf32>
    %11 = tpu.matmul %9, %10, %cst_8 {dimension_numbers = #tpu.dot_dimension_numbers<[1], [0], [0], [1], [0, 0, 1, 1], [], []>} : vector<128x128xbf16>, vector<128x256xbf16>, vector<128x256xf32> -> vector<128x256xf32>
    %c0_9 = arith.constant 0 : index
    %c0_10 = arith.constant 0 : index
    %12 = vector.load %arg5[%c0_9, %c0_10] : memref<1x256xf32, #tpu.memory_space<vmem>>, vector<1x256xf32>
    %13 = vector.broadcast %12 : vector<1x256xf32> to vector<128x256xf32>
    %14 = arith.addf %11, %13 : vector<128x256xf32>
    %cst_11 = arith.constant 0.000000e+00 : f32
    %15 = vector.broadcast %cst_11 : f32 to vector<128x256xf32>
    %16 = arith.subf %15, %14 : vector<128x256xf32>
    %17 = math.exp %16 : vector<128x256xf32>
    %cst_12 = arith.constant 1.000000e+00 : f32
    %18 = vector.broadcast %cst_12 : f32 to vector<128x256xf32>
    %19 = arith.addf %18, %17 : vector<128x256xf32>
    %20 = tpu.reciprocal %19 {approx = true} : vector<128x256xf32> -> vector<128x256xf32>
    %21 = arith.truncf %20 : vector<128x256xf32> to vector<128x256xbf16>
    %c0_13 = arith.constant 0 : index
    %c0_14 = arith.constant 0 : index
    %22 = vector.load %arg6[%c0_13, %c0_14] : memref<128x256xbf16, #tpu.memory_space<vmem>>, vector<128x256xbf16>
    tpu.vector_store %arg6[%c0_13, %c0_14], %21 {strides = array<i32>} : memref<128x256xbf16, #tpu.memory_space<vmem>>, vector<128x256xbf16>,
    return
  }
  func.func @transform_0(%arg0: i32) -> (i32, i32) {
    %c0_i32 = arith.constant 0 : i32
    %c0_i32_0 = arith.constant 0 : i32
    return %arg0, %c0_i32 : i32, i32
  }
  func.func @transform_1(%arg0: i32) -> (i32, i32) {
    %c0_i32 = arith.constant 0 : i32
    %c0_i32_0 = arith.constant 0 : i32
    %c0_i32_1 = arith.constant 0 : i32
    return %c0_i32, %c0_i32_0 : i32, i32
  }
  func.func @transform_2(%arg0: i32) -> (i32, i32) {
    %c0_i32 = arith.constant 0 : i32
    %c0_i32_0 = arith.constant 0 : i32
    %c0_i32_1 = arith.constant 0 : i32
    return %c0_i32, %c0_i32_0 : i32, i32
  }
  func.func @transform_3(%arg0: i32) -> (i32, i32) {
    %c0_i32 = arith.constant 0 : i32
    %c0_i32_0 = arith.constant 0 : i32
    %c0_i32_1 = arith.constant 0 : i32
    return %c0_i32, %c0_i32_0 : i32, i32
  }
  func.func @transform_4(%arg0: i32) -> (i32, i32) {
    %c0_i32 = arith.constant 0 : i32
    %c0_i32_0 = arith.constant 0 : i32
    %c0_i32_1 = arith.constant 0 : i32
    return %c0_i32, %c0_i32_0 : i32, i32
  }
  func.func @transform_5(%arg0: i32) -> (i32, i32) {
    %c0_i32 = arith.constant 0 : i32
    %c0_i32_0 = arith.constant 0 : i32
    return %arg0, %c0_i32 : i32, i32
  }
}

</mosaic_0001>

<bundles_post_ra>
// kernel: tpu_custom_call.1
= control target key start
LH: loop header
LB: loop body
LE: loop exit
PB: predicated region body
PF: predicated region fallthrough
CT: control target
= control target key end

     0   :  { %10 = vsyncpa [#allocation3], 0  ;;  %s1659_s0 = inlined_call_operand.vmem [shape: f32[256,32], index: 0, kind: input, shape index: {}]   ;;  %s1660_s1 = inlined_call_operand.vmem [shape: bf16[32,128], index: 1, kind: input, shape index: {}]   ;;  %s1661_s2 = inlined_call_operand.vmem [shape: f32[1,128], index: 2, kind: input, shape index: {}]   ;;  %s1662_s3 = inlined_call_operand.vmem [shape: bf16[128,256], index: 3, kind: input, shape index: {}]   ;;  %s1663_s4 = inlined_call_operand.vmem [shape: f32[1,256], index: 4, kind: input, shape index: {}]   ;;  %s1664_s5 = inlined_call_operand.hbm [shape: bf16[256,256], index: 5, kind: output, shape index: {}]  }
   0x1   :  { %12 = vsyncpa [#allocation3 + $0x1], 0  ;;  %s1402_s18 = smov 0   ;;  %s1404_s19 = smov 0  }
   0x2   :  { %s1406_s20 = smov 0   ;;  %s1408_s21 = smov 0  }
   0x3 LB: > { %s1423_s22 = sadd.s32 4294967295, %s1366_s21   ;;  %s990_s23 = sadd.s32 4294967294, %s1366_s21   ;;  %s1366_s21 = sphi %s1408_s21, %s1670_s21   ;;  %s1362_s20 = sphi %s1406_s20, %s1669_s20   ;;  %s1358_s19 = sphi %s1404_s19, %s1668_s19   ;;  %s1354_s18 = sphi %s1402_s18, %s1667_s18  }
   0x4   : > { %s1427_s24 = sadd.s32 1, %s1366_s21   ;;  %s135_s25 = sadd.s32 1, %s1362_s20 }
   0x5   : > { %s132_s26 = ssub.s32 %s1366_s21, %s1427_s24  ;;  %p145_p0 = scmp.ne.s32.totalorder %s1362_s20, %s1358_s19 }
   0x6   : > { %p133_p1 = scmp.eq.s32.totalorder %s132_s26, 0  ;;  %p146_p2 = scmp.eq.s32.totalorder %s1423_s22, 1 }
   0x7   : > { %p151_p3 = scmp.ne.s32.totalorder %s1358_s19, %s1354_s18  ;;  %p152_p4 = scmp.eq.s32.totalorder %s990_s23, 1 }
   0x8   : > { %s1438_s27 = scalar_select %p133_p1, %s1362_s20, %s135_s25  }
   0x9   : > { %p1440_p5 = por %p146_p2, %p145_p0  ;;  %p1444_p6 = por %p152_p4, %p151_p3 }
   0xa   : > { %p993_p7 = scmp.ge.s32.totalorder %s1366_s21, 1  ;;  %p191_p8 = scmp.lt.s32.totalorder %s1366_s21, 3 }
   0xc   : > { %p192_p9 = pnand %p993_p7, %p191_p8 }
   0xd   : > { %s995_s7 = sshll.u32 (!%p192_p9), %s1423_s22, 4  ;;  %s216_s23 = sand.u32 (!%p192_p9), 1, %s1358_s19  }
   0xe   : > { %195 = sbr.rel (%p192_p9) target bundleno = 541 (0x21d), region = 40  ;;  %p220_p10 = scmp.lt.s32.totalorder (!%p192_p9), %s995_s7, 31 }
   0xf   : > { %s1576_s26 = sshll.u32 (!%p192_p9), %s216_s23, 7  ;;  %s1063_s6 = sshll.u32 (!%p192_p9), %s1423_s22, 11 }
  0x10   : > { %s1585_s30 = scalar_lea.vmem (!%p192_p9), [#allocation2], %s1576_s26  ;;  %s1612_s9 = scalar_lea.hbm (!%p192_p9), %s1664_s5, %s1063_s6 }
  0x11   : > { %s1619_s10 = scalar_lea.sflag (!%p192_p9), [#allocation3], %s216_s23  ;;  %s1369_s22 = smov (!%p192_p9), [#allocation2]  }
  0x12   : > { %s1310_s12 = sshll.u32 (!%p192_p9), %s1369_s22, 4  ;;  %s1311_s12 = int_to_ptr.vmem [resolvable:$false] %s1310_s12 }
  0x13   : > { %v1152_v0 = vld [vmem:[%s1660_s1 + $0x8] sm:$0xff]   ;;  %v1153_v1 = vld [vmem:[%s1660_s1] sm:$0xff]   ;;  %s1672_s7 = smov (!%p220_p10, %s995_s7), 31  ;;  %v1156_v2 = vld [vmem:[%s1662_s3 + $0x74] ss:$8 sps:$4 sm:$0xff]   ;;  %vm274_vm0 = vcmask 261120  }
  0x14   : > { %1074 = vmatprep.subr.bf16.mxu0 %v1152_v0  ;;  %v1154_v3 = vld [vmem:[%s1662_s3 + $0x70] ss:$8 sps:$4 sm:$0xff]   ;;  %s996_s14 = sshll.u32 %s1672_s7, 3  ;;  %v1159_v4 = vld [vmem:[%s1662_s3 + $0x64] ss:$8 sps:$4 sm:$0xff]   ;;  %1094 = vmatprep.subr.bf16.mxu1 %v1156_v2  ;;  %v1368_v42 = vmov 0  }
  0x15   : > { %1075 = vmatpush3.bf16.msra.mxu0 %v1152_v0  ;;  %s1469_s25 = scalar_lea.vmem %s1659_s0, %s996_s14  ;;  %v1157_v5 = vld [vmem:[%s1662_s3 + $0x60] ss:$8 sps:$4 sm:$0xff]   ;;  %1102 = vmatpush1.bf16.msra.mxu1 %v1154_v3  ;;  %v1162_v15 = vld [vmem:[%s1662_s3 + $0x54] ss:$8 sps:$4 sm:$0xff]   ;;  %v1160_v17 = vld [vmem:[%s1662_s3 + $0x50] ss:$8 sps:$4 sm:$0xff]  }
  0x16   : > { %1076 = vmatprep.subr.bf16.mxu0 %v1153_v1  ;;  %v227_v6 = vld [vmem:[%s1469_s25] sm:$0xff]  ;;  %v228_v7 = vld [vmem:[%s1469_s25 + $0x8] sm:$0xff]  ;;  %v229_v8 = vld [vmem:[%s1469_s25 + $0x10] sm:$0xff]  ;;  %1095 = vmatprep.subr.bf16.mxu1 %v1159_v4  ;;  %s928_s7 = sshll.u32 %s1585_s30, 4  ;;  %s1312_s13 = scalar_lea.vmem %s1311_s12, 4096  ;;  %s1614_s7 = int_to_ptr.vmem [resolvable:$true] %s928_s7 }
  0x17   : > { %v243_v9 = vpack.c.bf16 %v228_v7, %v227_v6  ;;  %v230_v10 = vld [vmem:[%s1469_s25 + $0x18] sm:$0xff]  ;;  %v231_v11 = vld [vmem:[%s1469_s25 + $0x20] sm:$0xff]  ;;  %v232_v12 = vld [vmem:[%s1469_s25 + $0x28] sm:$0xff]  ;;  %590 = vmatprep.mubr.bf16.mxu1 %v1368_v42  ;;  %s1306_s11 = scalar_lea.vmem %s1614_s7, 2048  ;;  %p1313_p0 = scmp.lt.s32.totalorder %s1614_s7, %s1311_s12 }
  0x18   : > { %v244_v13 = vpack.c.bf16 %v230_v10, %v229_v8  ;;  %v245_v14 = vpack.c.bf16 %v232_v12, %v231_v11  ;;  %v233_v16 = vld [vmem:[%s1469_s25 + $0x30] sm:$0xff]  ;;  %v234_v18 = vld [vmem:[%s1469_s25 + $0x38] sm:$0xff]  ;;  %v235_v19 = vld [vmem:[%s1469_s25 + $0x40] sm:$0xff]  ;;  %p1307_p11 = scmp.ne.s32.totalorder %s1614_s7, %s1306_s11  ;;  %p1314_p1 = scmp.lt.s32.totalorder %s1312_s13, %s1306_s11 }
  0x19   : > { %1077 = vmatpush3.bf16.msra.mxu0 %v1153_v1  ;;  %1078 = vmatprep.mubr.msk.bf16.mxu0 %vm274_vm0, %v243_v9  ;;  %v236_v20 = vld [vmem:[%s1469_s25 + $0x48] sm:$0xff]  ;;  %v246_v22 = vpack.c.bf16 %v234_v18, %v233_v16  ;;  %v1168_v25 = vld [vmem:[%s1662_s3 + $0x34] ss:$8 sps:$4 sm:$0xff]   ;;  %v1166_v28 = vld [vmem:[%s1662_s3 + $0x30] ss:$8 sps:$4 sm:$0xff]  }
  0x1a   : > { %528 = vmatprep.subr.bf16.mxu0 %v1156_v2  ;;  %1103 = vmatpush1.bf16.msra.mxu1 %v1157_v5  ;;  %v1165_v21 = vld [vmem:[%s1662_s3 + $0x44] ss:$8 sps:$4 sm:$0xff]   ;;  %v247_v23 = vpack.c.bf16 %v236_v20, %v235_v19  ;;  %v1163_v24 = vld [vmem:[%s1662_s3 + $0x40] ss:$8 sps:$4 sm:$0xff]   ;;  %v237_v26 = vld [vmem:[%s1469_s25 + $0x50] sm:$0xff]  ;;  %p1308_p12 = pnand %p1307_p11, %p1440_p5  ;;  %p1315_p2 = por %p1314_p1, %p1313_p0 }
  0x1b   : > { %1096 = vmatprep.subr.bf16.mxu1 %v1162_v15  ;;  %v238_v27 = vld [vmem:[%s1469_s25 + $0x58] sm:$0xff]  ;;  %v239_v29 = vld [vmem:[%s1469_s25 + $0x60] sm:$0xff]  ;;  %v240_v30 = vld [vmem:[%s1469_s25 + $0x68] sm:$0xff] }
  0x1c   : > { %1079 = vmatmul.mubr.msk.bf16.vlgmr.msra.gmra.mxu0 %vm274_vm0, %v244_v13  ;;  %v248_v31 = vpack.c.bf16 %v238_v27, %v237_v26  ;;  %v249_v32 = vpack.c.bf16 %v240_v30, %v239_v29  ;;  %v241_v33 = vld [vmem:[%s1469_s25 + $0x70] sm:$0xff]  ;;  %v242_v34 = vld [vmem:[%s1469_s25 + $0x78] sm:$0xff]  ;;  %v1171_v36 = vld [vmem:[%s1662_s3 + $0x24] ss:$8 sps:$4 sm:$0xff]   ;;  %p1309_p13 = pneg %p1308_p12 }
  0x1d   : > { %1082 = vmatprep.mubr.msk.bf16.mxu0 %vm274_vm0, %v245_v14  ;;  %529 = vmatpush1.bf16.msra.mxu0 %v1154_v3  ;;  %v250_v35 = vpack.c.bf16 %v242_v34, %v241_v33  ;;  %v1169_v37 = vld [vmem:[%s1662_s3 + $0x20] ss:$8 sps:$4 sm:$0xff]   ;;  %v1174_v38 = vld [vmem:[%s1662_s3 + $0x14] ss:$8 sps:$4 sm:$0xff]   ;;  %v1172_v39 = vld [vmem:[%s1662_s3 + $0x10] ss:$8 sps:$4 sm:$0xff]  }
  0x1e   : > { %530 = vmatprep.subr.bf16.mxu0 %v1159_v4  ;;  %1104 = vmatpush1.bf16.msra.mxu1 %v1160_v17  ;;  %v1177_v40 = vld [vmem:[%s1662_s3 + $0x4] ss:$8 sps:$4 sm:$0xff]   ;;  %v1175_v41 = vld [vmem:[%s1662_s3] ss:$8 sps:$4 sm:$0xff]   ;;  %p1316_p3 = pnand %p1315_p2, %p1309_p13 }
  0x1f   : > { %1097 = vmatprep.subr.bf16.mxu1 %v1165_v21  ;;  %v997_v45 = vld [vmem:[%s1661_s2] ss:$0 sm:$0xff] }
  0x21   : > { %531 = vmatpush1.bf16.msra.mxu0 %v1157_v5 }
  0x22   : > { %532 = vmatprep.subr.bf16.mxu0 %v1162_v15  ;;  %1105 = vmatpush1.bf16.msra.mxu1 %v1163_v24 }
  0x23   : > { %1098 = vmatprep.subr.bf16.mxu1 %v1168_v25 }
  0x24   : > { %1083 = vmatmul.mubr.msk.bf16.gmra.mxu0 %vm274_vm0, %v246_v22 }
  0x25   : > { %1086 = vmatprep.mubr.msk.bf16.mxu0 %vm274_vm0, %v247_v23  ;;  %533 = vmatpush1.bf16.msra.mxu0 %v1160_v17 }
  0x26   : > { %534 = vmatprep.subr.bf16.mxu0 %v1165_v21  ;;  %1106 = vmatpush1.bf16.msra.mxu1 %v1166_v28 }
  0x27   : > { %1099 = vmatprep.subr.bf16.mxu1 %v1171_v36 }
  0x29   : > { %535 = vmatpush1.bf16.msra.mxu0 %v1163_v24 }
  0x2a   : > { %536 = vmatprep.subr.bf16.mxu0 %v1168_v25  ;;  %1107 = vmatpush1.bf16.msra.mxu1 %v1169_v37 }
  0x2b   : > { %1100 = vmatprep.subr.bf16.mxu1 %v1174_v38 }
  0x2c   : > { %1087 = vmatmul.mubr.msk.bf16.gmra.mxu0 %vm274_vm0, %v248_v31 }
  0x2d   : > { %1090 = vmatprep.mubr.msk.bf16.mxu0 %vm274_vm0, %v249_v32  ;;  %537 = vmatpush1.bf16.msra.mxu0 %v1166_v28 }
  0x2e   : > { %538 = vmatprep.subr.bf16.mxu0 %v1171_v36  ;;  %1108 = vmatpush1.bf16.msra.mxu1 %v1172_v39  ;;  %v438_v36 = vlaneseq }
  0x2f   : > { %1101 = vmatprep.subr.bf16.mxu1 %v1177_v40 }
  0x31   : > { %539 = vmatpush1.bf16.msra.mxu0 %v1169_v37  ;;  %v439_v37 = vshrl.u32 %v438_v36, 7 }
  0x32   : > { %540 = vmatprep.subr.bf16.mxu0 %v1174_v38  ;;  %1109 = vmatpush1.bf16.msra.mxu1 %v1175_v41 }
  0x33   : > { %v440_v38 = vsub.s32 0, %v439_v37 }
  0x34   : > { %1091 = vmatmul.mubr.msk.bf16.gmra.mxu0 %vm274_vm0, %v250_v35 }
  0x35   : > { %541 = vmatpush1.bf16.msra.mxu0 %v1172_v39  ;;  %560 = vmatprep.mubr.bf16.mxu0 %v1368_v42  ;;  %v436_v39 = vld [vmem:[%s1663_s4] sm:$0x3] }
  0x36   : > { %542 = vmatprep.subr.bf16.mxu0 %v1177_v40  ;;  %v444_v40 = vsub.s32 1, %v439_v37 }
  0x39   : > { %543 = vmatpush1.bf16.msra.mxu0 %v1175_v41  ;;  %v1548_v41 = vrot.slane %v436_v39, %v440_v38 }
  0xdc   : > { %v1080_v43 = vpop.f32.mrf.mxu0 }
  0xdd   : > { %v342_v58 = vadd.f32 %v1080_v43, %v997_v45  ;;  %v1550_v43 = vrot.slane %v436_v39, %v444_v40 }
  0xde   : > { %v333_v44 = vpop.f32.mrf.mxu0 }
  0xdf   : > { %v334_v47 = vadd.f32 %v997_v45, %v333_v44  ;;  %v398_v1 = vmax.f32 %v342_v58, 0.0 }
  0xe0   : > { %v1081_v46 = vpop.f32.mrf.mxu0 }
  0xe1   : > { %v396_v51 = vmax.f32 %v334_v47, 0.0  ;;  %v345_v54 = vadd.f32 %v1081_v46, %v997_v45 }
  0xe2   : > { %v336_v48 = vpop.f32.mrf.mxu0 }
  0xe3   : > { %v337_v49 = vadd.f32 %v997_v45, %v336_v48  ;;  %v399_v61 = vmax.f32 %v345_v54, 0.0 }
  0xe4   : > { %v1084_v50 = vpop.f32.mrf.mxu0 }
  0xe5   : > { %v397_v52 = vmax.f32 %v337_v49, 0.0  ;;  %v358_v56 = vadd.f32 %v1084_v50, %v997_v45  ;;  %v413_v4 = vpack.c.bf16 %v399_v61, %v398_v1 }
  0xe6   : > { %v349_v53 = vpop.f32.mrf.mxu0 }
  0xe7   : > { %v412_v55 = vpack.c.bf16 %v397_v52, %v396_v51  ;;  %v402_v62 = vmax.f32 %v358_v56, 0.0  ;;  %v350_v7 = vadd.f32 %v997_v45, %v349_v53 }
  0xe8   : > { %v1085_v57 = vpop.f32.mrf.mxu0 }
  0xe9   : > { %v361_v59 = vadd.f32 %v1085_v57, %v997_v45  ;;  %561 = vmatmul.mubr.bf16.vlgmr.msra.gmra.mxu0 %v412_v55  ;;  %v400_v13 = vmax.f32 %v350_v7, 0.0 }
  0xea   : > { %v352_v60 = vpop.f32.mrf.mxu0  ;;  %570 = vmatprep.mubr.bf16.mxu0 %v1368_v42 }
  0xeb   : > { %v403_v63 = vmax.f32 %v361_v59, 0.0  ;;  %v353_v5 = vadd.f32 %v997_v45, %v352_v60 }
  0xec   : > { %v1088_v0 = vpop.f32.mrf.mxu0 }
  0xed   : > { %v415_v2 = vpack.c.bf16 %v403_v63, %v402_v62  ;;  %v401_v10 = vmax.f32 %v353_v5, 0.0  ;;  %v374_v21 = vadd.f32 %v1088_v0, %v997_v45 }
  0xee   : > { %v365_v3 = vpop.f32.mrf.mxu0 }
  0xef   : > { %591 = vmatmul.mubr.bf16.vlgmr.msra.gmra.mxu1 %v415_v2  ;;  %v366_v8 = vadd.f32 %v997_v45, %v365_v3  ;;  %v414_v17 = vpack.c.bf16 %v401_v10, %v400_v13  ;;  %v406_v24 = vmax.f32 %v374_v21, 0.0 }
  0xf0   : > { %v1089_v6 = vpop.f32.mrf.mxu0  ;;  %600 = vmatprep.mubr.bf16.mxu1 %v1368_v42 }
  0xf1   : > { %571 = vmatmul.mubr.bf16.gmra.mxu0 %v413_v4  ;;  %v404_v14 = vmax.f32 %v366_v8, 0.0  ;;  %v377_v18 = vadd.f32 %v1089_v6, %v997_v45 }
  0xf2   : > { %v368_v9 = vpop.f32.mrf.mxu0  ;;  %580 = vmatprep.mubr.bf16.mxu0 %v1368_v42 }
  0xf3   : > { %v369_v11 = vadd.f32 %v997_v45, %v368_v9  ;;  %v407_v22 = vmax.f32 %v377_v18, 0.0 }
  0xf4   : > { %v1092_v12 = vpop.f32.mrf.mxu0 }
  0xf5   : > { %v405_v15 = vmax.f32 %v369_v11, 0.0  ;;  %v417_v25 = vpack.c.bf16 %v407_v22, %v406_v24  ;;  %v390_v30 = vadd.f32 %v1092_v12, %v997_v45 }
  0xf6   : > { %v381_v16 = vpop.f32.mrf.mxu0 }
  0xf7   : > { %v416_v19 = vpack.c.bf16 %v405_v15, %v404_v14  ;;  %v382_v26 = vadd.f32 %v997_v45, %v381_v16  ;;  %v410_v33 = vmax.f32 %v390_v30, 0.0 }
  0xf8   : > { %v1093_v20 = vpop.f32.mrf.mxu0 }
  0xf9   : > { %581 = vmatmul.mubr.bf16.gmra.mxu0 %v414_v17  ;;  %601 = vmatmul.mubr.bf16.gmra.mxu1 %v416_v19  ;;  %v408_v28 = vmax.f32 %v382_v26, 0.0  ;;  %v393_v31 = vadd.f32 %v1093_v20, %v997_v45 }
  0xfa   : > { %610 = vmatprep.mubr.bf16.mxu1 %v1368_v42  ;;  %v384_v23 = vpop.f32.mrf.mxu0 }
  0xfb   : > { %v385_v27 = vadd.f32 %v997_v45, %v384_v23  ;;  %v411_v34 = vmax.f32 %v393_v31, 0.0 }
  0xfd   : > { %v409_v29 = vmax.f32 %v385_v27, 0.0  ;;  %v419_v35 = vpack.c.bf16 %v411_v34, %v410_v33 }
  0xff   : > { %v418_v32 = vpack.c.bf16 %v409_v29, %v408_v28 }
 0x101   : > { %611 = vmatmul.mubr.bf16.gmra.mxu1 %v417_v25 }
 0x102   : > { %620 = vmatprep.mubr.bf16.mxu1 %v1368_v42 }
 0x109   : > { %621 = vmatmul.mubr.bf16.gmra.mxu1 %v418_v32 }
 0x10a   : > { %630 = vmatprep.mubr.bf16.mxu1 %v1368_v42 }
 0x111   : > { %631 = vmatmul.mubr.bf16.gmra.mxu1 %v419_v35 }
 0x1a9   : > { %v562_v44 = vpop.f32.mrf.mxu0 }
 0x1aa   : > { %v563_v45 = vadd.f32 %v562_v44, %v1548_v41 }
 0x1ab   : > { %v564_v42 = vpop.f32.mrf.mxu0 }
 0x1ac   : > { %v641_v46 = vsub.f32 0.0, %v563_v45  ;;  %v565_v47 = vadd.f32 %v564_v42, %v1550_v43 }
 0x1ad   : > { %v566_v48 = vpop.f32.mrf.mxu0 }
 0x1ae   : > { %v673_v49 = vmul.f32 1.442695, %v641_v46  ;;  %v642_v50 = vsub.f32 0.0, %v565_v47  ;;  %v567_v51 = vadd.f32 %v566_v48, %v1548_v41 }
 0x1af   : > { %v568_v52 = vpop.f32.mrf.mxu0  ;;  %v592_v53 = vpop.f32.mrf.mxu1 }
 0x1b0   : > { %1178 = vpow2.f32 %v673_v49  ;;  %v675_v54 = vmul.f32 1.442695, %v642_v50  ;;  %v643_v55 = vsub.f32 0.0, %v567_v51  ;;  %v569_v56 = vadd.f32 %v568_v52, %v1550_v43 }
 0x1b1   : > { %v593_v57 = vadd.f32 %v592_v53, %v1548_v41  ;;  %v572_v58 = vpop.f32.mrf.mxu0  ;;  %v594_v59 = vpop.f32.mrf.mxu1 }
 0x1b2   : > { %1180 = vpow2.f32 %v675_v54  ;;  %v677_v60 = vmul.f32 1.442695, %v643_v55  ;;  %v644_v61 = vsub.f32 0.0, %v569_v56  ;;  %v573_v62 = vadd.f32 %v572_v58, %v1548_v41 }
 0x1b3   : > { %v653_v63 = vsub.f32 0.0, %v593_v57  ;;  %v595_v0 = vadd.f32 %v594_v59, %v1550_v43  ;;  %v574_v1 = vpop.f32.mrf.mxu0  ;;  %v596_v2 = vpop.f32.mrf.mxu1 }
 0x1b4   : > { %1182 = vpow2.f32 %v677_v60  ;;  %v679_v3 = vmul.f32 1.442695, %v644_v61  ;;  %v645_v4 = vsub.f32 0.0, %v573_v62  ;;  %v575_v5 = vadd.f32 %v574_v1, %v1550_v43 }
 0x1b5   : > { %v697_v6 = vmul.f32 1.442695, %v653_v63  ;;  %v654_v7 = vsub.f32 0.0, %v595_v0  ;;  %v597_v8 = vadd.f32 %v596_v2, %v1548_v41  ;;  %v576_v9 = vpop.f32.mrf.mxu0  ;;  %v598_v10 = vpop.f32.mrf.mxu1 }
 0x1b6   : > { %1184 = vpow2.f32 %v679_v3  ;;  %v681_v11 = vmul.f32 1.442695, %v645_v4  ;;  %v646_v12 = vsub.f32 0.0, %v575_v5  ;;  %v577_v13 = vadd.f32 %v576_v9, %v1548_v41 }
 0x1b7   : > { %1186 = vpow2.f32 %v697_v6  ;;  %v699_v14 = vmul.f32 1.442695, %v654_v7  ;;  %v655_v15 = vsub.f32 0.0, %v597_v8  ;;  %v599_v16 = vadd.f32 %v598_v10, %v1550_v43  ;;  %v578_v17 = vpop.f32.mrf.mxu0 }
 0x1b8   : > { %1188 = vpow2.f32 %v681_v11  ;;  %v683_v18 = vmul.f32 1.442695, %v646_v12  ;;  %v647_v19 = vsub.f32 0.0, %v577_v13  ;;  %v579_v20 = vadd.f32 %v578_v17, %v1550_v43 }
 0x1b9   : > { %1190 = vpow2.f32 %v699_v14  ;;  %v701_v21 = vmul.f32 1.442695, %v655_v15  ;;  %v656_v22 = vsub.f32 0.0, %v599_v16  ;;  %v582_v23 = vpop.f32.mrf.mxu0  ;;  %v602_v24 = vpop.f32.mrf.mxu1 }
 0x1ba   : > { %1192 = vpow2.f32 %v683_v18  ;;  %v685_v25 = vmul.f32 1.442695, %v647_v19  ;;  %v648_v26 = vsub.f32 0.0, %v579_v20  ;;  %v583_v27 = vadd.f32 %v582_v23, %v1548_v41 }
 0x1bb   : > { %1194 = vpow2.f32 %v701_v21  ;;  %v703_v28 = vmul.f32 1.442695, %v656_v22  ;;  %v603_v29 = vadd.f32 %v602_v24, %v1548_v41  ;;  %v584_v30 = vpop.f32.mrf.mxu0  ;;  %v604_v31 = vpop.f32.mrf.mxu1 }
 0x1bc   : > { %1196 = vpow2.f32 %v685_v25  ;;  %v687_v32 = vmul.f32 1.442695, %v648_v26  ;;  %v649_v33 = vsub.f32 0.0, %v583_v27  ;;  %v585_v34 = vadd.f32 %v584_v30, %v1550_v43 }
 0x1bd   : > { %v1179_v35 = vpop.eup %1178  ;;  %1198 = vpow2.f32 %v703_v28  ;;  %v657_v36 = vsub.f32 0.0, %v603_v29  ;;  %v606_v37 = vpop.f32.mrf.mxu1  ;;  %v605_v53 = vadd.f32 %v604_v31, %v1550_v43 }
 0x1be   : > { %v737_v38 = vadd.f32 1.0, %v1179_v35  ;;  %1200 = vpow2.f32 %v687_v32  ;;  %v689_v39 = vmul.f32 1.442695, %v649_v33  ;;  %v650_v40 = vsub.f32 0.0, %v585_v34  ;;  %v586_v42 = vpop.f32.mrf.mxu0 }
 0x1bf   : > { %v1181_v44 = vpop.eup %1180  ;;  %v705_v45 = vmul.f32 1.442695, %v657_v36  ;;  %v608_v46 = vpop.f32.mrf.mxu1  ;;  %v587_v58 = vadd.f32 %v586_v42, %v1548_v41  ;;  %v607_v61 = vadd.f32 %v606_v37, %v1548_v41  ;;  %v658_v4 = vsub.f32 0.0, %v605_v53 }
 0x1c0   : > { %1202 = vrcp.f32 %v737_v38  ;;  %v738_v47 = vadd.f32 1.0, %v1181_v44  ;;  %v691_v49 = vmul.f32 1.442695, %v650_v40  ;;  %v588_v54 = vpop.f32.mrf.mxu0  ;;  %v609_v16 = vadd.f32 %v608_v46, %v1550_v43 }
 0x1c1   : > { %v1183_v48 = vpop.eup %1182  ;;  %1204 = vpow2.f32 %v689_v39  ;;  %v612_v50 = vpop.f32.mrf.mxu1  ;;  %v589_v1 = vadd.f32 %v588_v54, %v1550_v43  ;;  %v651_v8 = vsub.f32 0.0, %v587_v58  ;;  %v659_v11 = vsub.f32 0.0, %v607_v61 }
 0x1c2   : > { %1206 = vrcp.f32 %v738_v47  ;;  %v739_v51 = vadd.f32 1.0, %v1183_v48  ;;  %v707_v19 = vmul.f32 1.442695, %v658_v4  ;;  %v613_v20 = vadd.f32 %v612_v50, %v1548_v41 }
 0x1c3   : > { %v1185_v52 = vpop.eup %1184  ;;  %1208 = vpow2.f32 %v705_v45  ;;  %v614_v55 = vpop.f32.mrf.mxu1  ;;  %v652_v15 = vsub.f32 0.0, %v589_v1  ;;  %v693_v23 = vmul.f32 1.442695, %v651_v8  ;;  %v709_v26 = vmul.f32 1.442695, %v659_v11 }
 0x1c4   : > { %v1187_v56 = vpop.eup %1186  ;;  %1210 = vrcp.f32 %v739_v51  ;;  %v740_v57 = vadd.f32 1.0, %v1185_v52  ;;  %v615_v24 = vadd.f32 %v614_v55, %v1550_v43  ;;  %v660_v31 = vsub.f32 0.0, %v609_v16 }
 0x1c5   : > { %v1189_v59 = vpop.eup %1188  ;;  %v749_v60 = vadd.f32 1.0, %v1187_v56  ;;  %1212 = vpow2.f32 %v691_v49  ;;  %v616_v62 = vpop.f32.mrf.mxu1  ;;  %v695_v30 = vmul.f32 1.442695, %v652_v15  ;;  %v661_v35 = vsub.f32 0.0, %v613_v20 }
 0x1c6   : > { %v1191_v63 = vpop.eup %1190  ;;  %1214 = vrcp.f32 %v740_v57  ;;  %v741_v0 = vadd.f32 1.0, %v1189_v59  ;;  %v617_v27 = vadd.f32 %v616_v62, %v1548_v41  ;;  %v662_v40 = vsub.f32 0.0, %v615_v24 }
 0x1c7   : > { %v1193_v2 = vpop.eup %1192  ;;  %1216 = vrcp.f32 %v749_v60  ;;  %v750_v3 = vadd.f32 1.0, %v1191_v63  ;;  %v618_v5 = vpop.f32.mrf.mxu1  ;;  %v711_v50 = vmul.f32 1.442695, %v660_v31  ;;  %v713_v55 = vmul.f32 1.442695, %v661_v35 }
 0x1c8   : > { %v1195_v6 = vpop.eup %1194  ;;  %1218 = vrcp.f32 %v741_v0  ;;  %v742_v7 = vadd.f32 1.0, %v1193_v2  ;;  %v619_v32 = vadd.f32 %v618_v5, %v1550_v43  ;;  %v663_v46 = vsub.f32 0.0, %v617_v27 }
 0x1c9   : > { %v1197_v9 = vpop.eup %1196  ;;  %1220 = vrcp.f32 %v750_v3  ;;  %v751_v10 = vadd.f32 1.0, %v1195_v6  ;;  %v622_v12 = vpop.f32.mrf.mxu1  ;;  %v715_v60 = vmul.f32 1.442695, %v662_v40 }
 0x1ca   : > { %v1199_v13 = vpop.eup %1198  ;;  %1222 = vrcp.f32 %v742_v7  ;;  %v743_v14 = vadd.f32 1.0, %v1197_v9  ;;  %v623_v36 = vadd.f32 %v622_v12, %v1548_v41  ;;  %v664_v51 = vsub.f32 0.0, %v619_v32 }
 0x1cb   : > { %v1201_v17 = vpop.eup %1200  ;;  %1224 = vrcp.f32 %v751_v10  ;;  %v752_v18 = vadd.f32 1.0, %v1199_v13  ;;  %v624_v21 = vpop.f32.mrf.mxu1  ;;  %v717_v63 = vmul.f32 1.442695, %v663_v46 }
 0x1cc   : > { %1226 = vrcp.f32 %v743_v14  ;;  %v744_v22 = vadd.f32 1.0, %v1201_v17  ;;  %v625_v44 = vadd.f32 %v624_v21, %v1550_v43  ;;  %v665_v56 = vsub.f32 0.0, %v623_v36 }
 0x1cd   : > { %v1203_v25 = vpop.eup %1202  ;;  %1228 = vrcp.f32 %v752_v18  ;;  %v626_v28 = vpop.f32.mrf.mxu1  ;;  %v719_v3 = vmul.f32 1.442695, %v664_v51 }
 0x1ce   : > { %v1205_v29 = vpop.eup %1204  ;;  %1230 = vrcp.f32 %v744_v22  ;;  %v627_v47 = vadd.f32 %v626_v28, %v1548_v41  ;;  %v666_v61 = vsub.f32 0.0, %v625_v44  ;;  %v721_v8 = vmul.f32 1.442695, %v665_v56 }
 0x1cf   : > { %v1207_v33 = vpop.eup %1206  ;;  %v745_v34 = vadd.f32 1.0, %v1205_v29  ;;  %1232 = vpow2.f32 %v707_v19  ;;  %v628_v37 = vpop.f32.mrf.mxu1 }
 0x1d0   : > { %v1209_v38 = vpop.eup %1208  ;;  %v1046_v39 = vpack.c.bf16 %v1207_v33, %v1203_v25  ;;  %1234 = vpow2.f32 %v693_v23  ;;  %v629_v52 = vadd.f32 %v628_v37, %v1550_v43  ;;  %v667_v0 = vsub.f32 0.0, %v627_v47 }
 0x1d1   : > { %v1211_v45 = vpop.eup %1210  ;;  %1236 = vrcp.f32 %v745_v34  ;;  %v753_v42 = vadd.f32 1.0, %v1209_v38  ;;  %v632_v48 = vpop.f32.mrf.mxu1  ;;  %v723_v12 = vmul.f32 1.442695, %v666_v61 }
 0x1d2   : > { %v1213_v49 = vpop.eup %1212  ;;  %897 = vst [vmem:[%s1585_s30] sm:$0xff] %v1046_v39  ;;  %1238 = vpow2.f32 %v709_v26  ;;  %v633_v1 = vadd.f32 %v632_v48, %v1548_v41  ;;  %v668_v4 = vsub.f32 0.0, %v629_v52  ;;  %v725_v14 = vmul.f32 1.442695, %v667_v0 }
 0x1d3   : > { %v1215_v53 = vpop.eup %1214  ;;  %1240 = vrcp.f32 %v753_v42  ;;  %v746_v54 = vadd.f32 1.0, %v1213_v49  ;;  %v634_v57 = vpop.f32.mrf.mxu1 }
 0x1d4   : > { %v1217_v58 = vpop.eup %1216  ;;  %v1047_v59 = vpack.c.bf16 %v1215_v53, %v1211_v45  ;;  %1242 = vpow2.f32 %v695_v30  ;;  %v635_v9 = vadd.f32 %v634_v57, %v1550_v43  ;;  %v669_v15 = vsub.f32 0.0, %v633_v1 }
 0x1d5   : > { %v1219_v62 = vpop.eup %1218  ;;  %1244 = vrcp.f32 %v746_v54  ;;  %v636_v5 = vpop.f32.mrf.mxu1  ;;  %v727_v18 = vmul.f32 1.442695, %v668_v4 }
 0x1d6   : > { %v1221_v2 = vpop.eup %1220  ;;  %898 = vst [vmem:[%s1585_s30 + $0x8] sm:$0xff] %v1047_v59  ;;  %1246 = vpow2.f32 %v711_v50  ;;  %v637_v16 = vadd.f32 %v636_v5, %v1548_v41  ;;  %v670_v21 = vsub.f32 0.0, %v635_v9  ;;  %v729_v26 = vmul.f32 1.442695, %v669_v15 }
 0x1d7   : > { %v1223_v6 = vpop.eup %1222  ;;  %v1052_v7 = vpack.c.bf16 %v1221_v2, %v1217_v58  ;;  %1248 = vpow2.f32 %v713_v55  ;;  %v638_v33 = vpop.f32.mrf.mxu1 }
 0x1d8   : > { %v1225_v10 = vpop.eup %1224  ;;  %v1048_v11 = vpack.c.bf16 %v1223_v6, %v1219_v62  ;;  %1250 = vpow2.f32 %v715_v60  ;;  %v671_v27 = vsub.f32 0.0, %v637_v16  ;;  %v731_v30 = vmul.f32 1.442695, %v670_v21 }
 0x1d9   : > { %v1227_v13 = vpop.eup %1226  ;;  %903 = vst [vmem:[%s1585_s30 + $0x30] sm:$0xff] %v1052_v7  ;;  %1252 = vpow2.f32 %v717_v63  ;;  %v639_v40 = vadd.f32 %v638_v33, %v1550_v43 }
 0x1da   : > { %v1229_v17 = vpop.eup %1228  ;;  %899 = vst [vmem:[%s1585_s30 + $0x10] sm:$0xff] %v1048_v11  ;;  %1254 = vpow2.f32 %v719_v3  ;;  %v733_v35 = vmul.f32 1.442695, %v671_v27 }
 0x1db   : > { %v1231_v19 = vpop.eup %1230  ;;  %v1053_v20 = vpack.c.bf16 %v1229_v17, %v1225_v10  ;;  %1256 = vpow2.f32 %v721_v8  ;;  %v672_v51 = vsub.f32 0.0, %v639_v40 }
 0x1dc   : > { %v1233_v22 = vpop.eup %1232  ;;  %v1049_v23 = vpack.c.bf16 %v1231_v19, %v1227_v13  ;;  %1258 = vpow2.f32 %v723_v12 }
 0x1dd   : > { %v1235_v24 = vpop.eup %1234  ;;  %904 = vst [vmem:[%s1585_s30 + $0x38] sm:$0xff] %v1053_v20  ;;  %v754_v25 = vadd.f32 1.0, %v1233_v22  ;;  %1260 = vpow2.f32 %v725_v14  ;;  %v735_v59 = vmul.f32 1.442695, %v672_v51 }
 0x1de   : > { %v1237_v28 = vpop.eup %1236  ;;  %900 = vst [vmem:[%s1585_s30 + $0x18] sm:$0xff] %v1049_v23  ;;  %v747_v41 = vadd.f32 1.0, %v1235_v24  ;;  %1262 = vpow2.f32 %v727_v18 }
 0x1df   : > { %v1239_v29 = vpop.eup %1238  ;;  %1264 = vrcp.f32 %v754_v25 }
 0x1e0   : > { %v1241_v31 = vpop.eup %1240  ;;  %1266 = vrcp.f32 %v747_v41  ;;  %v755_v32 = vadd.f32 1.0, %v1239_v29 }
 0x1e1   : > { %v1243_v34 = vpop.eup %1242  ;;  %1268 = vpow2.f32 %v729_v26 }
 0x1e2   : > { %v1245_v36 = vpop.eup %1244  ;;  %1270 = vrcp.f32 %v755_v32  ;;  %v748_v37 = vadd.f32 1.0, %v1243_v34 }
 0x1e3   : > { %v1247_v38 = vpop.eup %1246  ;;  %v1050_v39 = vpack.c.bf16 %v1245_v36, %v1237_v28  ;;  %1272 = vpow2.f32 %v731_v30 }
 0x1e4   : > { %v1249_v44 = vpop.eup %1248  ;;  %1274 = vrcp.f32 %v748_v37  ;;  %v756_v45 = vadd.f32 1.0, %v1247_v38 }
 0x1e5   : > { %v1251_v42 = vpop.eup %1250  ;;  %901 = vst [vmem:[%s1585_s30 + $0x20] sm:$0xff] %v1050_v39  ;;  %v757_v46 = vadd.f32 1.0, %v1249_v44  ;;  %1276 = vpow2.f32 %v733_v35 }
 0x1e6   : > { %v1253_v47 = vpop.eup %1252  ;;  %1278 = vrcp.f32 %v756_v45  ;;  %v758_v48 = vadd.f32 1.0, %v1251_v42 }
 0x1e7   : > { %v1255_v49 = vpop.eup %1254  ;;  %1280 = vrcp.f32 %v757_v46  ;;  %v759_v50 = vadd.f32 1.0, %v1253_v47 }
 0x1e8   : > { %v1257_v52 = vpop.eup %1256  ;;  %1282 = vrcp.f32 %v758_v48  ;;  %v760_v53 = vadd.f32 1.0, %v1255_v49 }
 0x1e9   : > { %v1259_v54 = vpop.eup %1258  ;;  %1284 = vrcp.f32 %v759_v50  ;;  %v761_v43 = vadd.f32 1.0, %v1257_v52 }
 0x1ea   : > { %v1261_v55 = vpop.eup %1260  ;;  %1286 = vrcp.f32 %v760_v53  ;;  %v762_v56 = vadd.f32 1.0, %v1259_v54 }
 0x1eb   : > { %v1263_v57 = vpop.eup %1262  ;;  %1288 = vrcp.f32 %v761_v43  ;;  %v763_v58 = vadd.f32 1.0, %v1261_v55 }
 0x1ec   : > { %v1265_v60 = vpop.eup %1264  ;;  %1290 = vrcp.f32 %v762_v56  ;;  %v764_v61 = vadd.f32 1.0, %v1263_v57 }
 0x1ed   : > { %v1267_v62 = vpop.eup %1266  ;;  %v1054_v63 = vpack.c.bf16 %v1265_v60, %v1241_v31  ;;  %1292 = vrcp.f32 %v763_v58 }
 0x1ee   : > { %v1269_v0 = vpop.eup %1268  ;;  %1294 = vrcp.f32 %v764_v61 }
 0x1ef   : > { %v1271_v1 = vpop.eup %1270  ;;  %905 = vst [vmem:[%s1585_s30 + $0x40] sm:$0xff] %v1054_v63  ;;  %v765_v2 = vadd.f32 1.0, %v1269_v0  ;;  %1296 = vpow2.f32 %v735_v59 }
 0x1f0   : > { %v1273_v3 = vpop.eup %1272 }
 0x1f1   : > { %v1275_v4 = vpop.eup %1274  ;;  %v766_v5 = vadd.f32 1.0, %v1273_v3  ;;  %1298 = vrcp.f32 %v765_v2 }
 0x1f2   : > { %v1277_v6 = vpop.eup %1276  ;;  %v1051_v7 = vpack.c.bf16 %v1275_v4, %v1267_v62 }
 0x1f3   : > { %v1279_v8 = vpop.eup %1278  ;;  %1300 = vrcp.f32 %v766_v5  ;;  %v767_v20 = vadd.f32 1.0, %v1277_v6 }
 0x1f4   : > { %v1281_v9 = vpop.eup %1280  ;;  %902 = vst [vmem:[%s1585_s30 + $0x28] sm:$0xff] %v1051_v7  ;;  %v1055_v10 = vpack.c.bf16 %v1279_v8, %v1271_v1 }
 0x1f5   : > { %v1283_v11 = vpop.eup %1282  ;;  %1302 = vrcp.f32 %v767_v20 }
 0x1f6   : > { %v1285_v12 = vpop.eup %1284  ;;  %906 = vst [vmem:[%s1585_s30 + $0x48] sm:$0xff] %v1055_v10  ;;  %v1056_v13 = vpack.c.bf16 %v1283_v11, %v1281_v9 }
 0x1f7   : > { %v1287_v14 = vpop.eup %1286 }
 0x1f8   : > { %v1289_v15 = vpop.eup %1288  ;;  %907 = vst [vmem:[%s1585_s30 + $0x50] sm:$0xff] %v1056_v13  ;;  %v1057_v16 = vpack.c.bf16 %v1287_v14, %v1285_v12 }
 0x1f9   : > { %v1291_v17 = vpop.eup %1290 }
 0x1fa   : > { %v1293_v18 = vpop.eup %1292  ;;  %908 = vst [vmem:[%s1585_s30 + $0x58] sm:$0xff] %v1057_v16  ;;  %v1058_v19 = vpack.c.bf16 %v1291_v17, %v1289_v15 }
 0x1fb   : > { %v1295_v21 = vpop.eup %1294 }
 0x1fc   : > { %v1297_v22 = vpop.eup %1296  ;;  %909 = vst [vmem:[%s1585_s30 + $0x60] sm:$0xff] %v1058_v19  ;;  %v1059_v23 = vpack.c.bf16 %v1295_v21, %v1293_v18 }
 0x1fd   : > { %v768_v24 = vadd.f32 1.0, %v1297_v22 }
 0x1fe   : > { %910 = vst [vmem:[%s1585_s30 + $0x68] sm:$0xff] %v1059_v23  ;;  %v1299_v25 = vpop.eup %1298 }
 0x1ff   : > { %1304 = vrcp.f32 %v768_v24 }
 0x200   : > { %v1301_v26 = vpop.eup %1300 }
 0x201   : > { %v1060_v27 = vpack.c.bf16 %v1301_v26, %v1299_v25 }
 0x202   : > { %v1303_v28 = vpop.eup %1302 }
 0x203   : > { %911 = vst [vmem:[%s1585_s30 + $0x70] sm:$0xff] %v1060_v27 }
 0x20c   : > { %v1305_v41 = vpop.eup %1304 }
 0x20d   : > { %v1061_v29 = vpack.c.bf16 %v1305_v41, %v1303_v28 }
 0x20f   : > { %912 = vst [vmem:[%s1585_s30 + $0x78] sm:$0xff] %v1061_v29 }
 0x210   : > { %1319 = shalt.err (!%p1316_p3)
}
 0x211   : > { %s1320_s14 = scalar_lea.hbm %s1612_s9, 2048  ;;  %s1324_s17 = scalar_lea.hbm %s1664_s5, 4096 }
 0x212   : > { %p1321_p4 = scmp.ne.s32.totalorder %s1612_s9, %s1320_s14  ;;  %p1325_p9 = scmp.lt.s32.totalorder %s1612_s9, %s1664_s5 }
 0x213   : > { %p1326_p10 = scmp.lt.s32.totalorder %s1324_s17, %s1320_s14 }
 0x214   : > { %p1322_p7 = pnand %p1321_p4, %p1440_p5 }
 0x215   : > { %p1327_p11 = por %p1326_p10, %p1325_p9 }
 0x216   : > { %p1323_p8 = pneg %p1322_p7 }
 0x218   : > { %p1328_p12 = pnand %p1327_p11, %p1323_p8 }
 0x21a   : > { %1331 = shalt.err (!%p1328_p12)
}
 0x21b   : > { %s1370_s30 = smov 128   ;;  %s1371_s6 = smov 8  }
 0x21c   : > { %1110 = dma.vmem_to_hbm [thread:$0]  (%p1440_p5), %s1614_s7, 2048, %s1612_s9, %s1619_s10, %s1370_s30, %s1370_s30, %s1371_s6  }
 0x21d PF: > { %p1116_p13 = scmp.ge.s32.totalorder %s1366_s21, 2  ;;  %s943_s8 = sand.u32 1, %s1354_s18  }
 0x21e   : > { %s944_s25 = scalar_lea.sflag [#allocation3], %s943_s8 }
 0x21f   : > { %p1113_p0 = pnand %p1116_p13, %p1444_p6 }
 0x221   : > { %p1114_p1 = pneg %p1113_p0 }
 0x223   : > { %1349 = dma.done.wait (%p1114_p1), %s944_s25, 2048  }
 0x224   : > { %1351 = vsyncadd (%p1114_p1), %s944_s25, 4294965248  ;;  %p15_p2 = scmp.ge.s32.totalorder %s1427_s24, 4   ;;  %s1667_s18 = smov %s1358_s19 }
 0x225   : > { %s1668_s19 = smov %s1362_s20  ;;  %s1669_s20 = smov %s1438_s27 }
 0x226   : > { %s1670_s21 = smov %s1427_s24  ;;  %17 = sbr.rel (!%p15_p2) target bundleno = 3 (0x3), region = 75 }
 0x22b   :  { %949 = vsyncpa [#allocation3], 1 }
 0x22c   :  { %951 = vsyncpa [#allocation3 + $0x1], 1 }

</bundles_post_ra>
